<compile_context>
chip_gen: v7x
topology: tpu7x:2x2x1
jax: 0.10.0
libtpu: 0.0.40
codegen_flags: <defaults>
</compile_context>

<pallas_src>
import functools

import jax
import jax.numpy as jnp
from jax.experimental import pallas as pl
from jax.experimental.pallas import tpu as pltpu


_NCORES = 2  # leading 'parallel' grid axis: uses both TensorCores on v7x; harmless elsewhere.
_TARGET_BLOCK_BYTES = 2 * 1024 * 1024  # per-input block; 2 inputs x 2 buffers ~= 8 MiB VMEM.


def _round_up(x, m):
    return ((x + m - 1) // m) * m


def _cdiv(a, b):
    return (a + b - 1) // b


def _kl_sum_kernel(p_ref, q_ref, out_ref, acc_ref, *, rows, tile_rows, tiles_per_core):
    """Accumulates sum over rows of KL(softmax(p_row) || softmax(q_row)).

    Grid is (core, tile). Each core owns a contiguous slab of row-tiles, accumulates its
    partial sum in a VMEM scratch, and writes it to out block (core, 0, 0) on its last tile.
    """
    c = pl.program_id(0)
    i = pl.program_id(1)

    @pl.when(i == 0)
    def _():
        acc_ref[...] = jnp.zeros_like(acc_ref)

    # Logical (unclamped) tile index. The BlockSpec index_map clamps it so the DMA always
    # stays in bounds; tiles whose logical start is past `rows` (core-1 duplicates) are
    # skipped entirely, and the ragged tail is masked per-row below.
    b = c * tiles_per_core + i
    row0 = b * tile_rows

    @pl.when(row0 < rows)
    def _():
        p = p_ref[...].astype(jnp.float32)
        q = q_ref[...].astype(jnp.float32)

        # Stable log-softmax bookkeeping; exp() results reused for Z and the probabilities.
        m_p = jnp.max(p, axis=-1, keepdims=True)
        m_q = jnp.max(q, axis=-1, keepdims=True)
        s_p = jnp.exp(p - m_p)
        s_q = jnp.exp(q - m_q)
        z_p = jnp.sum(s_p, axis=-1, keepdims=True)
        z_q = jnp.sum(s_q, axis=-1, keepdims=True)
        num = jnp.sum(s_p * (p - q), axis=-1, keepdims=True)

        # KL(P||Q) per row = num/z_p - lse_p + lse_q
        #                  = num/z_p + (m_q - m_p) + log(z_q/z_p)   (single log per row)
        kl_row = num / z_p + (m_q - m_p) + jnp.log(z_q / z_p)  # (tile_rows, 1)

        # Mask rows past `rows` (ragged tail of the last tile). Any garbage in the OOB part
        # of the block stays confined to its own row by the per-row reductions, and the
        # select drops NaN/Inf from unselected rows.
        row_ids = row0 + jax.lax.broadcasted_iota(jnp.int32, (tile_rows, 1), 0)
        kl_row = jnp.where(row_ids < rows, kl_row, 0.0)

        acc_ref[...] += jnp.sum(kl_row)

    @pl.when(i == pl.num_programs(1) - 1)
    def _():
        out_ref[...] = acc_ref[...]


@functools.partial(jax.jit, static_argnames=("free_bits",))
def categorical_kl_div_loss_with_free_bits(p_logits, q_logits, *, free_bits):
    """Returns (kl_div_clamped, real_kl_div), both float32 scalars."""
    assert p_logits.shape == q_logits.shape
    B, L, N, K = p_logits.shape
    rows = B * L * N

    # Row-major flatten (free, no data movement): (B, L, N, K) -> (rows, K).
    p2 = p_logits.reshape(rows, K)
    q2 = q_logits.reshape(rows, K)

    itemsize = jnp.dtype(p_logits.dtype).itemsize

    # Largest row-tile keeping each input block around _TARGET_BLOCK_BYTES, rounded to a
    # sublane multiple of 8, and never bigger than one core's share of the rows.
    if rows < 8:
        tile_rows = rows  # block == full dim, always legal
    else:
        tile_rows = max(8, (_TARGET_BLOCK_BYTES // max(K * itemsize, 1)) // 8 * 8)
        rows_per_core = _round_up(_cdiv(rows, _NCORES), 8)
        tile_rows = min(tile_rows, rows_per_core)

    n_tiles = _cdiv(rows, tile_rows)
    tiles_per_core = _cdiv(n_tiles, _NCORES)

    def in_index_map(c, i):
        # Clamp so the source block always lies inside the array; the kernel skips/masks
        # work past `rows` using the unclamped index, so clamped duplicates contribute 0.
        return (jnp.minimum(c * tiles_per_core + i, n_tiles - 1), 0)

    kernel = functools.partial(
        _kl_sum_kernel,
        rows=rows,
        tile_rows=tile_rows,
        tiles_per_core=tiles_per_core,
    )

    cost = pl.CostEstimate(
        flops=10 * rows * K,
        transcendentals=2 * rows * K,
        bytes_accessed=2 * rows * K * itemsize + 4 * _NCORES,
    )

    partials = pl.pallas_call(
        kernel,
        out_shape=jax.ShapeDtypeStruct((_NCORES, 1, 1), jnp.float32),
        grid_spec=pltpu.PrefetchScalarGridSpec(
            num_scalar_prefetch=0,
            grid=(_NCORES, tiles_per_core),
            in_specs=[
                pl.BlockSpec((tile_rows, K), in_index_map),
                pl.BlockSpec((tile_rows, K), in_index_map),
            ],
            out_specs=pl.BlockSpec((1, 1, 1), lambda c, i: (c, 0, 0)),
            scratch_shapes=[pltpu.VMEM((1, 1, 1), jnp.float32)],
        ),
        compiler_params=pltpu.CompilerParams(
            dimension_semantics=("parallel", "arbitrary"),
            vmem_limit_bytes=32 * 1024 * 1024,
        ),
        cost_estimate=cost,
    )(p2, q2)

    kl_sum = jnp.sum(partials)
    real_kl_div = kl_sum / jnp.float32(B * L)  # sum over N, mean over (B, L)
    kl_div = jnp.maximum(jnp.float32(free_bits), real_kl_div)
    return kl_div, real_kl_div


def _reference(p_logits, q_logits, free_bits):
    """Pure-JAX reference matching torch.distributions.kl_divergence for OneHotCategorical."""
    p_log = jax.nn.log_softmax(p_logits, axis=-1)
    q_log = jax.nn.log_softmax(q_logits, axis=-1)
    kl = jnp.sum(jnp.exp(p_log) * (p_log - q_log), axis=-1)  # (B, L, N)
    kl = kl.sum(axis=2).mean()
    return jnp.maximum(jnp.float32(free_bits), kl), kl


if __name__ == "__main__":
    key = jax.random.PRNGKey(0)
    k1, k2 = jax.random.split(key)

    # Small shapes consistent with world-model usage: (batch, seq, stoch, classes).
    B, L, N, K = 2, 8, 16, 32
    p_logits = jax.random.normal(k1, (B, L, N, K), dtype=jnp.float32)
    q_logits = jax.random.normal(k2, (B, L, N, K), dtype=jnp.float32)

    free_bits = 1.0
    kl_div, real_kl_div = categorical_kl_div_loss_with_free_bits(
        p_logits, q_logits, free_bits=free_bits
    )
    jax.block_until_ready((kl_div, real_kl_div))

    ref_kl, ref_real = _reference(p_logits, q_logits, free_bits)
    assert jnp.allclose(real_kl_div, ref_real, rtol=1e-4, atol=1e-5), (real_kl_div, ref_real)
    assert jnp.allclose(kl_div, ref_kl, rtol=1e-4, atol=1e-5), (kl_div, ref_kl)

    print("KERNEL_OK")
</pallas_src>

<mosaic_0001>
module attributes {stable_mosaic.version = 11 : i64} {
  func.func @_kl_sum_kernel(%arg0: i32, %arg1: i32, %arg2: memref<128x32xf32, #tpu.memory_space<vmem>>, %arg3: memref<128x32xf32, #tpu.memory_space<vmem>>, %arg4: memref<1x1x1xf32, #tpu.memory_space<vmem>>, %arg5: memref<1x1x1xf32, #tpu.memory_space<vmem>>) attributes {dimension_semantics = [#tpu.dimension_semantics<parallel>, #tpu.dimension_semantics<arbitrary>], iteration_bounds = array<i64: 2, 1>, scalar_prefetch = 0 : i64, scratch_operands = 1 : i64, tpu.core_type = #tpu.core_type<tc>, window_params = [{transform_indices = @transform_0, window_bounds = array<i64: 128, 32>}, {transform_indices = @transform_1, window_bounds = array<i64: 128, 32>}, {transform_indices = @transform_2, window_bounds = array<i64: 1, 1, 1>}]} {
    %c0_i32 = arith.constant 0 : i32
    %0 = arith.cmpi eq, %arg1, %c0_i32 : i32
    %1 = arith.extui %0 : i1 to i32
    %c0_i32_0 = arith.constant 0 : i32
    %2 = arith.cmpi ne, %1, %c0_i32_0 : i32
    scf.if %2 {
      %cst = arith.constant 0.000000e+00 : f32
      %12 = vector.broadcast %cst : f32 to vector<1x1x1xf32>
      %c0 = arith.constant 0 : index
      %c0_4 = arith.constant 0 : index
      %c0_5 = arith.constant 0 : index
      %13 = vector.load %arg5[%c0, %c0_4, %c0_5] : memref<1x1x1xf32, #tpu.memory_space<vmem>>, vector<1x1x1xf32>
      tpu.vector_store %arg5[%c0, %c0_4, %c0_5], %12 {strides = array<i32>} : memref<1x1x1xf32, #tpu.memory_space<vmem>>, vector<1x1x1xf32>,
    } else {
    }
    %c1_i32 = arith.constant 1 : i32
    %3 = arith.muli %arg0, %c1_i32 : i32
    %4 = arith.addi %3, %arg1 : i32
    %c128_i32 = arith.constant 128 : i32
    %5 = arith.muli %4, %c128_i32 : i32
    %c256_i32 = arith.constant 256 : i32
    %6 = arith.cmpi slt, %5, %c256_i32 : i32
    %7 = arith.extui %6 : i1 to i32
    %c0_i32_1 = arith.constant 0 : i32
    %8 = arith.cmpi ne, %7, %c0_i32_1 : i32
    scf.if %8 {
      %c0 = arith.constant 0 : index
      %c0_4 = arith.constant 0 : index
      %12 = vector.load %arg2[%c0, %c0_4] : memref<128x32xf32, #tpu.memory_space<vmem>>, vector<128x32xf32>
      %c0_5 = arith.constant 0 : index
      %c0_6 = arith.constant 0 : index
      %13 = vector.load %arg3[%c0_5, %c0_6] : memref<128x32xf32, #tpu.memory_space<vmem>>, vector<128x32xf32>
      %cst = arith.constant dense<0xFF800000> : vector<128xf32>
      %14 = vector.multi_reduction <maximumf>, %12, %cst [1] : vector<128x32xf32> to vector<128xf32>
      %15 = vector.shape_cast %14 : vector<128xf32> to vector<128x1xf32>
      %cst_7 = arith.constant dense<0xFF800000> : vector<128xf32>
      %16 = vector.multi_reduction <maximumf>, %13, %cst_7 [1] : vector<128x32xf32> to vector<128xf32>
      %17 = vector.shape_cast %16 : vector<128xf32> to vector<128x1xf32>
      %18 = vector.broadcast %15 : vector<128x1xf32> to vector<128x32xf32>
      %19 = arith.subf %12, %18 : vector<128x32xf32>
      %20 = math.exp %19 : vector<128x32xf32>
      %21 = vector.broadcast %17 : vector<128x1xf32> to vector<128x32xf32>
      %22 = arith.subf %13, %21 : vector<128x32xf32>
      %23 = math.exp %22 : vector<128x32xf32>
      %cst_8 = arith.constant dense<0.000000e+00> : vector<128xf32>
      %24 = vector.multi_reduction <add>, %20, %cst_8 [1] : vector<128x32xf32> to vector<128xf32>
      %25 = vector.shape_cast %24 : vector<128xf32> to vector<128x1xf32>
      %cst_9 = arith.constant dense<0.000000e+00> : vector<128xf32>
      %26 = vector.multi_reduction <add>, %23, %cst_9 [1] : vector<128x32xf32> to vector<128xf32>
      %27 = vector.shape_cast %26 : vector<128xf32> to vector<128x1xf32>
      %28 = arith.subf %12, %13 : vector<128x32xf32>
      %29 = arith.mulf %20, %28 : vector<128x32xf32>
      %cst_10 = arith.constant dense<0.000000e+00> : vector<128xf32>
      %30 = vector.multi_reduction <add>, %29, %cst_10 [1] : vector<128x32xf32> to vector<128xf32>
      %31 = vector.shape_cast %30 : vector<128xf32> to vector<128x1xf32>
      %32 = arith.divf %31, %25 : vector<128x1xf32>
      %33 = arith.subf %17, %15 : vector<128x1xf32>
      %34 = arith.addf %32, %33 : vector<128x1xf32>
      %35 = arith.divf %27, %25 : vector<128x1xf32>
      %36 = math.log %35 : vector<128x1xf32>
      %37 = arith.addf %34, %36 : vector<128x1xf32>
      %38 = tpu.iota {dimensions = array<i32: 0>} : vector<128x1xi32>
      %39 = vector.broadcast %5 : i32 to vector<128x1xi32>
      %40 = arith.addi %39, %38 : vector<128x1xi32>
      %c256_i32_11 = arith.constant 256 : i32
      %41 = vector.broadcast %c256_i32_11 : i32 to vector<128x1xi32>
      %42 = arith.cmpi slt, %40, %41 : vector<128x1xi32>
      %cst_12 = arith.constant 0.000000e+00 : f32
      %43 = vector.broadcast %cst_12 : f32 to vector<128x1xf32>
      %44 = arith.select %42, %37, %43 : vector<128x1xi1>, vector<128x1xf32>
      %c0_13 = arith.constant 0 : index
      %c0_14 = arith.constant 0 : index
      %c0_15 = arith.constant 0 : index
      %45 = vector.load %arg5[%c0_13, %c0_14, %c0_15] : memref<1x1x1xf32, #tpu.memory_space<vmem>>, vector<1x1x1xf32>
      %46 = vector.shape_cast %44 : vector<128x1xf32> to vector<1x128x1xf32>
      %cst_16 = arith.constant dense<0.000000e+00> : vector<1xf32>
      %47 = vector.multi_reduction <add>, %46, %cst_16 [1, 2] : vector<1x128x1xf32> to vector<1xf32>
      %48 = vector.shape_cast %47 : vector<1xf32> to vector<1x1x1xf32>
      %49 = vector.extract %48[0, 0, 0] : f32 from vector<1x1x1xf32>
      %50 = vector.broadcast %49 : f32 to vector<1x1x1xf32>
      %51 = arith.addf %45, %50 : vector<1x1x1xf32>
      %c0_17 = arith.constant 0 : index
      %c0_18 = arith.constant 0 : index
      %c0_19 = arith.constant 0 : index
      %52 = vector.load %arg5[%c0_17, %c0_18, %c0_19] : memref<1x1x1xf32, #tpu.memory_space<vmem>>, vector<1x1x1xf32>
      tpu.vector_store %arg5[%c0_17, %c0_18, %c0_19], %51 {strides = array<i32>} : memref<1x1x1xf32, #tpu.memory_space<vmem>>, vector<1x1x1xf32>,
    } else {
    }
    %c0_i32_2 = arith.constant 0 : i32
    %9 = arith.cmpi eq, %arg1, %c0_i32_2 : i32
    %10 = arith.extui %9 : i1 to i32
    %c0_i32_3 = arith.constant 0 : i32
    %11 = arith.cmpi ne, %10, %c0_i32_3 : i32
    scf.if %11 {
      %c0 = arith.constant 0 : index
      %c0_4 = arith.constant 0 : index
      %c0_5 = arith.constant 0 : index
      %12 = vector.load %arg5[%c0, %c0_4, %c0_5] : memref<1x1x1xf32, #tpu.memory_space<vmem>>, vector<1x1x1xf32>
      %c0_6 = arith.constant 0 : index
      %c0_7 = arith.constant 0 : index
      %c0_8 = arith.constant 0 : index
      %13 = vector.load %arg4[%c0_6, %c0_7, %c0_8] : memref<1x1x1xf32, #tpu.memory_space<vmem>>, vector<1x1x1xf32>
      tpu.vector_store %arg4[%c0_6, %c0_7, %c0_8], %12 {strides = array<i32>} : memref<1x1x1xf32, #tpu.memory_space<vmem>>, vector<1x1x1xf32>,
    } else {
    }
    return
  }
  func.func @transform_0(%arg0: i32, %arg1: i32) -> (i32, i32) {
    %c1_i32 = arith.constant 1 : i32
    %0 = arith.muli %arg0, %c1_i32 : i32
    %1 = arith.addi %0, %arg1 : i32
    %c1_i32_0 = arith.constant 1 : i32
    %2 = arith.minsi %1, %c1_i32_0 : i32
    %c0_i32 = arith.constant 0 : i32
    %c0_i32_1 = arith.constant 0 : i32
    return %2, %c0_i32 : i32, i32
  }
  func.func @transform_1(%arg0: i32, %arg1: i32) -> (i32, i32) {
    %c1_i32 = arith.constant 1 : i32
    %0 = arith.muli %arg0, %c1_i32 : i32
    %1 = arith.addi %0, %arg1 : i32
    %c1_i32_0 = arith.constant 1 : i32
    %2 = arith.minsi %1, %c1_i32_0 : i32
    %c0_i32 = arith.constant 0 : i32
    %c0_i32_1 = arith.constant 0 : i32
    return %2, %c0_i32 : i32, i32
  }
  func.func @transform_2(%arg0: i32, %arg1: i32) -> (i32, i32, i32) {
    %c0_i32 = arith.constant 0 : i32
    %c0_i32_0 = arith.constant 0 : i32
    %c0_i32_1 = arith.constant 0 : i32
    return %arg0, %c0_i32, %c0_i32_0 : i32, i32, i32
  }
}

</mosaic_0001>

<bundles_post_ra>
// kernel: categorical_kl_div_loss_with_free_bits.1
= control target key start
LH: loop header
LB: loop body
LE: loop exit
PB: predicated region body
PF: predicated region fallthrough
CT: control target
= control target key end

     0   :  { %7 = vsyncpa [#allocation4], 0  ;;  %s2242_s0 = inlined_call_operand.hbm [shape: f32[256,32], index: 0, kind: input, shape index: {}]   ;;  %s2243_s1 = inlined_call_operand.hbm [shape: f32[256,32], index: 1, kind: input, shape index: {}]   ;;  %s2244_s2 = inlined_call_operand.vmem [shape: f32[2,1,1], index: 2, kind: output, shape index: {}]  }
   0x1   :  { %9 = vsyncpa [#allocation4 + $0x1], 0 }
   0x2   :  { %10 = vsyncpa [#allocation6], 0 }
   0x3   :  { %12 = vsyncpa [#allocation6 + $0x1], 0  ;;  %s1335_s9 = smov 0   ;;  %s1337_s10 = smov 0  }
   0x4   :  { %s1339_s11 = smov 0   ;;  %s1341_s12 = smov 0  }
   0x5   :  { %s1343_s13 = smov 0   ;;  %s1345_s14 = smov 0  }
   0x6 LB: > { %s987_s15 = sadd.s32 4294967295, %s1313_s14   ;;  %s30_s16 = sadd.s32 1, %s1309_s13  ;;  %s1313_s14 = sphi %s1345_s14, %s18_s14   ;;  %s1309_s13 = sphi %s1343_s13, %s2346_s13   ;;  %s1305_s12 = sphi %s1341_s12, %s2345_s12   ;;  %s1301_s11 = sphi %s1339_s11, %s2344_s11   ;;  %s1297_s10 = sphi %s1337_s10, %s2343_s10   ;;  %s1293_s9 = sphi %s1335_s9, %s2342_s9  }
   0x7   : > { %p32_p0 = scmp.ge.s32.totalorder %s30_s16, 2  ;;  %p35_p1 = scmp.lt.s32.totalorder %s1309_s13, 1 }
   0x8   : > { %s43_s17 = sadd.s32 1, %s1301_s11  ;;  %p50_p2 = scmp.ne.s32.totalorder %s1301_s11, %s1297_s10 }
   0x9   : > { %s2348_s16 = smov (%p32_p0, %s30_s16), 0  ;;  %p51_p4 = scmp.eq.s32.totalorder %s1313_s14, 0 }
   0xa   : > { %s1372_s18 = scalar_select %p35_p1, %s1309_s13, 1 }
   0xb   : > { %p38_p3 = scmp.lt.s32.totalorder %s2348_s16, 1  ;;  %p56_p5 = scmp.ne.s32.totalorder %s1297_s10, %s1293_s9 }
   0xc   : > { %p57_p6 = scmp.eq.s32.totalorder %s987_s15, 0  ;;  %p52_p7 = por %p51_p4, %p50_p2 }
   0xd   : > { %s39_s19 = scalar_select %p38_p3, %s2348_s16, 1 }
   0xe   : > { %p1378_p8 = por %p57_p6, %p56_p5  ;;  %p1019_p10 = scmp.lt.s32.totalorder %s1313_s14, 2 }
   0xf   : > { %s40_s21 = ssub.s32 %s1372_s18, %s39_s19  ;;  %s1385_s22 = sand.u32 1, %s1301_s11  }
  0x10   : > { %s2272_s20 = scalar_select %p1378_p8, 1, 0 }
  0x11   : > { %p41_p9 = scmp.eq.s32.totalorder %s40_s21, 0  ;;  %s1004_s23 = sshll.u32 %s1372_s18, 11 }
  0x12   : > { %s991_s25 = sshll.u32 %s1385_s22, 7  ;;  %s1397_s28 = scalar_lea.hbm %s2242_s0, %s1004_s23 }
  0x13   : > { %s1389_s24 = scalar_select %p41_p9, %s1301_s11, %s43_s17  }
  0x14   : > { %s142_s29 = scalar_lea.vmem [#allocation3], %s991_s25  ;;  %p1401_p11 = pnand %p1019_p10, %p52_p7 }
  0x15   : > { %s152_s30 = sshll.u32 %s142_s29, 4  ;;  %s139_s4 = scalar_lea.sflag [#allocation4], %s1385_s22  ;;  %s1405_s30 = int_to_ptr.vmem [resolvable:$true] %s152_s30 }
  0x16   : > { %s1199_s5 = scalar_lea.hbm %s1397_s28, 2048  ;;  %p1201_p13 = pneg %p1401_p11 }
  0x17   : > { %p1200_p12 = scmp.ne.s32.totalorder %s1397_s28, %s1199_s5  ;;  %s1204_s8 = scalar_lea.hbm %s2242_s0, 4096 }
  0x18   : > { %p1205_p2 = scmp.lt.u32.totalorder %s1397_s28, %s2242_s0  ;;  %p1206_p3 = scmp.lt.u32.totalorder %s1204_s8, %s1199_s5 }
  0x19   : > { %p1202_p0 = pnand %p1201_p13, %p1200_p12  ;;  %p1208_p5 = scmp.lt.u32.totalorder %s1199_s5, %s1397_s28 }
  0x1a   : > { %p1207_p4 = por %p1206_p3, %p1205_p2 }
  0x1b   : > { %p1203_p1 = pneg %p1202_p0 }
  0x1c   : > { %p1209_p6 = por %p1208_p5, %p1207_p4 }
  0x1e   : > { %p1210_p7 = pnand %p1209_p6, %p1203_p1 }
  0x20   : > { %1213 = shalt.err (!%p1210_p7)
}
  0x21   : > { %s1214_s17 = scalar_lea.vmem %s1405_s30, 2048  ;;  %s1315_s19 = smov [#allocation3]  }
  0x22   : > { %p1215_p9 = scmp.ne.s32.totalorder %s1405_s30, %s1214_s17  ;;  %s1219_s21 = sshll.u32 %s1315_s19, 4  ;;  %s1220_s21 = int_to_ptr.vmem [resolvable:$false] %s1219_s21 }
  0x23   : > { %s1221_s26 = scalar_lea.vmem %s1220_s21, 4096  ;;  %p1222_p0 = scmp.lt.s32.totalorder %s1405_s30, %s1220_s21 }
  0x24   : > { %p1217_p10 = pnand %p1215_p9, %p1201_p13  ;;  %p1223_p2 = scmp.lt.s32.totalorder %s1221_s26, %s1214_s17 }
  0x26   : > { %p1218_p12 = pneg %p1217_p10  ;;  %p1224_p3 = por %p1223_p2, %p1222_p0 }
  0x28   : > { %p1225_p4 = pnand %p1224_p3, %p1218_p12 }
  0x2a   : > { %1228 = shalt.err (!%p1225_p4)
}
  0x2b   : > { %s1316_s27 = smov 128   ;;  %s1317_s29 = smov 8  }
  0x2c   : > { %1015 = dma.hbm_to_vmem [thread:$0]  (!%p1401_p11), %s1397_s28, 2048, %s1405_s30, %s139_s4, %s1316_s27, %s1316_s27, %s1317_s29  }
  0x2d   : > { %p997_p1 = scmp.ge.s32.totalorder %s1313_s14, 1  ;;  %p184_p5 = scmp.lt.s32.totalorder %s1313_s14, 3 }
  0x2e   : > { %s1449_s8 = scalar_lea.hbm %s2243_s1, %s1004_s23  ;;  %s166_s9 = scalar_lea.vmem [#allocation5], %s991_s25 }
  0x2f   : > { %p1440_p6 = pnand %p997_p1, %p184_p5  ;;  %s176_s15 = sshll.u32 %s166_s9, 4  ;;  %s1453_s15 = int_to_ptr.vmem [resolvable:$true] %s176_s15 }
  0x30   : > { %s163_s28 = scalar_lea.sflag [#allocation6], %s1385_s22  ;;  %s1229_s30 = scalar_lea.hbm %s1449_s8, 2048 }
  0x31   : > { %p1230_p7 = scmp.ne.s32.totalorder %s1449_s8, %s1229_s30  ;;  %s1234_s23 = scalar_lea.hbm %s2243_s1, 4096 }
  0x32   : > { %p1235_p12 = scmp.lt.u32.totalorder %s1449_s8, %s2243_s1  ;;  %p1236_p0 = scmp.lt.u32.totalorder %s1234_s23, %s1229_s30 }
  0x33   : > { %p1232_p9 = pnand %p1230_p7, %p1201_p13  ;;  %p1238_p3 = scmp.lt.u32.totalorder %s1229_s30, %s1449_s8 }
  0x34   : > { %p1237_p2 = por %p1236_p0, %p1235_p12 }
  0x35   : > { %p1233_p10 = pneg %p1232_p9 }
  0x36   : > { %p1239_p4 = por %p1238_p3, %p1237_p2 }
  0x38   : > { %p1240_p1 = pnand %p1239_p4, %p1233_p10 }
  0x3a   : > { %1243 = shalt.err (!%p1240_p1)
}
  0x3b   : > { %s1244_s25 = scalar_lea.vmem %s1453_s15, 2048  ;;  %s1318_s21 = smov [#allocation5]  }
  0x3c   : > { %p1245_p5 = scmp.ne.s32.totalorder %s1453_s15, %s1244_s25  ;;  %s1249_s26 = sshll.u32 %s1318_s21, 4  ;;  %s1250_s26 = int_to_ptr.vmem [resolvable:$false] %s1249_s26 }
  0x3d   : > { %s1251_s6 = scalar_lea.vmem %s1250_s26, 4096  ;;  %p1252_p8 = scmp.lt.s32.totalorder %s1453_s15, %s1250_s26 }
  0x3e   : > { %p1247_p7 = pnand %p1245_p5, %p1201_p13  ;;  %p1253_p12 = scmp.lt.s32.totalorder %s1251_s6, %s1244_s25 }
  0x40   : > { %p1248_p9 = pneg %p1247_p7  ;;  %p1254_p0 = por %p1253_p12, %p1252_p8 }
  0x42   : > { %p1255_p2 = pnand %p1254_p0, %p1248_p9 }
  0x44   : > { %1258 = shalt.err (!%p1255_p2)
}
  0x45   : > { %1018 = dma.hbm_to_vmem [thread:$0]  (!%p1401_p11), %s1449_s8, 2048, %s1453_s15, %s163_s28, %s1316_s27, %s1316_s27, %s1317_s29  }
  0x46   : > { %188 = sbr.rel (%p1440_p6) target bundleno = 715 (0x2cb), region = 28  ;;  %s190_s7 = sand.u32 (!%p1440_p6), 1, %s1297_s10  }
  0x47   : > { %s998_s9 = sshll.u32 (!%p1440_p6), %s190_s7, 7  ;;  %s191_s30 = scalar_lea.sflag (!%p1440_p6), [#allocation4], %s190_s7 }
  0x48   : > { %s1487_s18 = scalar_lea.vmem (!%p1440_p6), [#allocation3], %s998_s9  ;;  %p2275_p8 = scmp.ne.s32.totalorder (!%p1440_p6), %s2272_s20, 0 }
  0x4d   : > { %1284 = dma.done.wait (%p2275_p8), %s191_s30, 2048  }
  0x4e   : > { %1286 = vsyncadd (%p2275_p8), %s191_s30, 4294965248  ;;  %s200_s22 = scalar_lea.sflag [#allocation6], %s190_s7  ;;  %s1493_s3 = scalar_lea.vmem [#allocation5], %s998_s9 }
  0x4f   : > { %1288 = dma.done.wait (%p2275_p8), %s200_s22, 2048  }
  0x50   : > { %1290 = vsyncadd (%p2275_p8), %s200_s22, 4294965248  ;;  %p235_p11 = scmp.lt.s32.totalorder %s1305_s12, 1  ;;  %vm242_vm0 = vcmask 0   ;;  %s1000_s27 = sshll.u32 %s1305_s12, 7  ;;  %v1319_v0 = vmov 0.0  }
  0x51   : > { %243 = vst.msk [vmem:[#allocation2] sm:$0x1] %vm242_vm0, %v1319_v0  ;;  %p1001_p13 = scmp.ge.s32.totalorder %s1000_s27, 256 }
  0x52   : > { %s1503_s29 = scalar_select %p235_p11, %s1305_s12, 1 }
  0x53   : > { %249 = sbr.rel (%p1001_p13) target bundleno = 707 (0x2c3), region = 44 }
  0x54   : > { %s237_s15 = scalar_lea.vmem %s2244_s2, %s1503_s29 }
  0x5a   : > { %v1512_v1 = vld [vmem:[%s1487_s18 + $0x10] sm:$0xff]  ;;  %vm282_vm1 = vcmask 261120   ;;  %v1515_v2 = vld [vmem:[%s1487_s18] sm:$0xff]  ;;  %v1518_v3 = vld [vmem:[%s1487_s18 + $0x18] sm:$0xff]  ;;  %vm846_vm5 = vcmask 7168  }
  0x5b   : > { %v289_v4 = vsel %vm282_vm1, %v1512_v1, -inf  ;;  %v283_v5 = vsel %vm282_vm1, %v1515_v2, -inf  ;;  %v1525_v6 = vld [vmem:[%s1487_s18 + $0x8] sm:$0xff]  ;;  %v292_v7 = vsel %vm282_vm1, %v1518_v3, -inf  ;;  %v1535_v10 = vld [vmem:[%s1487_s18 + $0x20] sm:$0xff]  ;;  %v1545_v14 = vld [vmem:[%s1487_s18 + $0x30] sm:$0xff] }
  0x5c   : > { %290 = vmax.xlane.f32.xlu1 %v289_v4  ;;  %284 = vmax.xlane.f32.xlu0 %v283_v5  ;;  %v286_v8 = vsel %vm282_vm1, %v1525_v6, -inf  ;;  %v1532_v9 = vld [vmem:[%s1487_s18 + $0x28] sm:$0xff]  ;;  %v295_v12 = vsel %vm282_vm1, %v1535_v10, -inf  ;;  %v1542_v13 = vld [vmem:[%s1493_s3] sm:$0xff]  ;;  %v301_v16 = vsel %vm282_vm1, %v1545_v14, -inf  ;;  %v1552_v17 = vld [vmem:[%s1487_s18 + $0x38] sm:$0xff] }
  0x5d   : > { %v298_v11 = vsel %vm282_vm1, %v1532_v9, -inf  ;;  %v331_v15 = vsel %vm282_vm1, %v1542_v13, -inf  ;;  %v1555_v18 = vld [vmem:[%s1493_s3 + $0x8] sm:$0xff]  ;;  %v304_v19 = vsel %vm282_vm1, %v1552_v17, -inf  ;;  %v1562_v21 = vld [vmem:[%s1487_s18 + $0x40] sm:$0xff]  ;;  %v1565_v22 = vld [vmem:[%s1493_s3 + $0x10] sm:$0xff] }
  0x5e   : > { %v334_v20 = vsel %vm282_vm1, %v1555_v18, -inf  ;;  %v307_v23 = vsel %vm282_vm1, %v1562_v21, -inf  ;;  %v337_v24 = vsel %vm282_vm1, %v1565_v22, -inf  ;;  %v1572_v25 = vld [vmem:[%s1487_s18 + $0x48] sm:$0xff]  ;;  %v1575_v26 = vld [vmem:[%s1493_s3 + $0x18] sm:$0xff]  ;;  %v1582_v29 = vld [vmem:[%s1487_s18 + $0x50] sm:$0xff] }
  0x5f   : > { %v310_v27 = vsel %vm282_vm1, %v1572_v25, -inf  ;;  %v340_v28 = vsel %vm282_vm1, %v1575_v26, -inf  ;;  %v1585_v30 = vld [vmem:[%s1493_s3 + $0x20] sm:$0xff]  ;;  %v313_v31 = vsel %vm282_vm1, %v1582_v29, -inf  ;;  %v1592_v33 = vld [vmem:[%s1487_s18 + $0x58] sm:$0xff]  ;;  %v1595_v34 = vld [vmem:[%s1493_s3 + $0x28] sm:$0xff] }
  0x60   : > { %293 = vmax.xlane.f32.xlu1 %v292_v7  ;;  %287 = vmax.xlane.f32.xlu0 %v286_v8  ;;  %v343_v32 = vsel %vm282_vm1, %v1585_v30, -inf  ;;  %v316_v35 = vsel %vm282_vm1, %v1592_v33, -inf  ;;  %v346_v36 = vsel %vm282_vm1, %v1595_v34, -inf  ;;  %v1602_v37 = vld [vmem:[%s1487_s18 + $0x60] sm:$0xff]  ;;  %v1605_v38 = vld [vmem:[%s1493_s3 + $0x30] sm:$0xff]  ;;  %v1612_v41 = vld [vmem:[%s1487_s18 + $0x68] sm:$0xff] }
  0x61   : > { %v319_v39 = vsel %vm282_vm1, %v1602_v37, -inf  ;;  %v349_v40 = vsel %vm282_vm1, %v1605_v38, -inf  ;;  %v1615_v42 = vld [vmem:[%s1493_s3 + $0x38] sm:$0xff]  ;;  %v322_v43 = vsel %vm282_vm1, %v1612_v41, -inf  ;;  %v1622_v45 = vld [vmem:[%s1487_s18 + $0x70] sm:$0xff]  ;;  %v1625_v46 = vld [vmem:[%s1493_s3 + $0x40] sm:$0xff] }
  0x62   : > { %v352_v44 = vsel %vm282_vm1, %v1615_v42, -inf  ;;  %v325_v47 = vsel %vm282_vm1, %v1622_v45, -inf  ;;  %v355_v48 = vsel %vm282_vm1, %v1625_v46, -inf  ;;  %v1632_v49 = vld [vmem:[%s1487_s18 + $0x78] sm:$0xff]  ;;  %v1635_v50 = vld [vmem:[%s1493_s3 + $0x48] sm:$0xff]  ;;  %v1645_v54 = vld [vmem:[%s1493_s3 + $0x50] sm:$0xff] }
  0x63   : > { %v328_v51 = vsel %vm282_vm1, %v1632_v49, -inf  ;;  %v358_v52 = vsel %vm282_vm1, %v1635_v50, -inf  ;;  %v1642_v53 = vld [vmem:[%s1493_s3 + $0x58] sm:$0xff]  ;;  %v361_v56 = vsel %vm282_vm1, %v1645_v54, -inf  ;;  %v1652_v57 = vld [vmem:[%s1493_s3 + $0x68] sm:$0xff]  ;;  %v1655_v58 = vld [vmem:[%s1493_s3 + $0x60] sm:$0xff] }
  0x64   : > { %299 = vmax.xlane.f32.xlu1 %v298_v11  ;;  %296 = vmax.xlane.f32.xlu0 %v295_v12  ;;  %v364_v55 = vsel %vm282_vm1, %v1642_v53, -inf  ;;  %v370_v59 = vsel %vm282_vm1, %v1652_v57, -inf  ;;  %v367_v60 = vsel %vm282_vm1, %v1655_v58, -inf  ;;  %v1662_v61 = vld [vmem:[%s1493_s3 + $0x78] sm:$0xff]  ;;  %v1665_v62 = vld [vmem:[%s1493_s3 + $0x70] sm:$0xff] }
  0x65   : > { %v376_v63 = vsel %vm282_vm1, %v1662_v61, -inf  ;;  %v373_v0 = vsel %vm282_vm1, %v1665_v62, -inf }
  0x68   : > { %332 = vmax.xlane.f32.xlu1 %v331_v15  ;;  %302 = vmax.xlane.f32.xlu0 %v301_v16 }
  0x6c   : > { %305 = vmax.xlane.f32.xlu1 %v304_v19  ;;  %335 = vmax.xlane.f32.xlu0 %v334_v20 }
  0x70   : > { %308 = vmax.xlane.f32.xlu1 %v307_v23  ;;  %338 = vmax.xlane.f32.xlu0 %v337_v24 }
  0x74   : > { %311 = vmax.xlane.f32.xlu1 %v310_v27  ;;  %341 = vmax.xlane.f32.xlu0 %v340_v28 }
  0x78   : > { %314 = vmax.xlane.f32.xlu1 %v313_v31  ;;  %344 = vmax.xlane.f32.xlu0 %v343_v32 }
  0x7c   : > { %317 = vmax.xlane.f32.xlu1 %v316_v35  ;;  %347 = vmax.xlane.f32.xlu0 %v346_v36 }
  0x80   : > { %320 = vmax.xlane.f32.xlu1 %v319_v39  ;;  %350 = vmax.xlane.f32.xlu0 %v349_v40 }
  0x84   : > { %323 = vmax.xlane.f32.xlu1 %v322_v43  ;;  %353 = vmax.xlane.f32.xlu0 %v352_v44 }
  0x88   : > { %326 = vmax.xlane.f32.xlu1 %v325_v47  ;;  %356 = vmax.xlane.f32.xlu0 %v355_v48 }
  0x8c   : > { %329 = vmax.xlane.f32.xlu1 %v328_v51  ;;  %359 = vmax.xlane.f32.xlu0 %v358_v52 }
  0x90   : > { %365 = vmax.xlane.f32.xlu1 %v364_v55  ;;  %362 = vmax.xlane.f32.xlu0 %v361_v56 }
  0x94   : > { %371 = vmax.xlane.f32.xlu1 %v370_v59  ;;  %368 = vmax.xlane.f32.xlu0 %v367_v60 }
  0x98   : > { %377 = vmax.xlane.f32.xlu1 %v376_v63  ;;  %374 = vmax.xlane.f32.xlu0 %v373_v0 }
  0xe9   : > { %v1671_v4 = vpop.xlane.xlu1 %290  ;;  %v1673_v5 = vpop.xlane.xlu0 %284 }
  0xea   : > { %2276 = vst [vmem:[#allocation9_spill] sm:$0xff] %v1671_v4  ;;  %2277 = vst [vmem:[#allocation10_spill] sm:$0xff] %v1673_v5  ;;  %v381_v7 = vsub.f32 %v1512_v1, %v1671_v4  ;;  %v379_v8 = vsub.f32 %v1515_v2, %v1673_v5 }
  0xec   : > { %v395_v11 = vmul.f32 1.442695, %v379_v8  ;;  %v399_v16 = vmul.f32 1.442695, %v381_v7 }
  0xed   : > { %v1679_v12 = vpop.xlane.xlu1 %293  ;;  %v1681_v15 = vpop.xlane.xlu0 %287 }
  0xee   : > { %2278 = vst [vmem:[#allocation11_spill] sm:$0xff] %v1679_v12  ;;  %2279 = vst [vmem:[#allocation12_spill] sm:$0xff] %v1681_v15  ;;  %v382_v19 = vsub.f32 %v1518_v3, %v1679_v12  ;;  %v380_v20 = vsub.f32 %v1525_v6, %v1681_v15  ;;  %1071 = vpow2.f32 %v395_v11 }
  0xef   : > { %1073 = vpow2.f32 %v399_v16 }
  0xf0   : > { %v397_v23 = vmul.f32 1.442695, %v380_v20  ;;  %v401_v28 = vmul.f32 1.442695, %v382_v19 }
  0xf1   : > { %v1687_v24 = vpop.xlane.xlu1 %299  ;;  %v1689_v27 = vpop.xlane.xlu0 %296 }
  0xf2   : > { %2280 = vst [vmem:[#allocation13_spill] sm:$0xff] %v1687_v24  ;;  %2281 = vst [vmem:[#allocation14_spill] sm:$0xff] %v1689_v27  ;;  %v384_v31 = vsub.f32 %v1532_v9, %v1687_v24  ;;  %v383_v32 = vsub.f32 %v1535_v10, %v1689_v27  ;;  %1075 = vpow2.f32 %v397_v23 }
  0xf3   : > { %1077 = vpow2.f32 %v401_v28 }
  0xf4   : > { %v403_v35 = vmul.f32 1.442695, %v383_v32  ;;  %v405_v36 = vmul.f32 1.442695, %v384_v31 }
  0xf5   : > { %v1695_v39 = vpop.xlane.xlu1 %332  ;;  %v1697_v40 = vpop.xlane.xlu0 %302 }
  0xf6   : > { %2282 = vst [vmem:[#allocation15_spill] sm:$0xff] %v1695_v39  ;;  %2283 = vst [vmem:[#allocation16_spill] sm:$0xff] %v1697_v40  ;;  %v427_v43 = vsub.f32 %v1542_v13, %v1695_v39  ;;  %v385_v47 = vsub.f32 %v1545_v14, %v1697_v40  ;;  %1079 = vpow2.f32 %v403_v35 }
  0xf7   : > { %1081 = vpow2.f32 %v405_v36 }
  0xf8   : > { %v407_v48 = vmul.f32 1.442695, %v385_v47  ;;  %v1705_v51 = vpop.eup %1071  ;;  %v443_v56 = vmul.f32 1.442695, %v427_v43 }
  0xf9   : > { %v1707_v52 = vpop.xlane.xlu1 %305  ;;  %v1709_v55 = vpop.xlane.xlu0 %335  ;;  %v475_v0 = vsel %vm282_vm1, %v1705_v51, 0.0 }
  0xfa   : > { %2284 = vst [vmem:[#allocation17_spill] sm:$0xff] %v1707_v52  ;;  %2285 = vst [vmem:[#allocation18_spill] sm:$0xff] %v1709_v55  ;;  %v386_v59 = vsub.f32 %v1552_v17, %v1707_v52  ;;  %v428_v60 = vsub.f32 %v1555_v18, %v1709_v55  ;;  %1083 = vpow2.f32 %v407_v48  ;;  %v1719_v7 = vpop.eup %1073  ;;  %476 = vadd.xlane.f32.xlu0 %v475_v0 }
  0xfb   : > { %1085 = vpow2.f32 %v443_v56  ;;  %v481_v32 = vsel %vm282_vm1, %v1719_v7, 0.0 }
  0xfc   : > { %v445_v8 = vmul.f32 1.442695, %v428_v60  ;;  %v1721_v11 = vpop.eup %1075  ;;  %v409_v16 = vmul.f32 1.442695, %v386_v59 }
  0xfd   : > { %v1723_v19 = vpop.xlane.xlu1 %308  ;;  %v1725_v20 = vpop.xlane.xlu0 %338  ;;  %v478_v35 = vsel %vm282_vm1, %v1721_v11, 0.0 }
  0xfe   : > { %2286 = vst [vmem:[#allocation19_spill] sm:$0xff] %v1723_v19  ;;  %2287 = vst [vmem:[#allocation20_spill] sm:$0xff] %v1725_v20  ;;  %v387_v23 = vsub.f32 %v1562_v21, %v1723_v19  ;;  %v429_v28 = vsub.f32 %v1565_v22, %v1725_v20  ;;  %1087 = vpow2.f32 %v445_v8  ;;  %v1737_v36 = vpop.eup %1077  ;;  %482 = vadd.xlane.f32.xlu0 %v481_v32  ;;  %479 = vadd.xlane.f32.xlu1 %v478_v35 }
  0xff   : > { %1089 = vpow2.f32 %v409_v16  ;;  %v484_v16 = vsel %vm282_vm1, %v1737_v36, 0.0 }
 0x100   : > { %v447_v43 = vmul.f32 1.442695, %v429_v28  ;;  %v1739_v47 = vpop.eup %1079  ;;  %v411_v59 = vmul.f32 1.442695, %v387_v23 }
 0x101   : > { %v1741_v48 = vpop.xlane.xlu1 %311  ;;  %v1743_v56 = vpop.xlane.xlu0 %341  ;;  %v487_v32 = vsel %vm282_vm1, %v1739_v47, 0.0 }
 0x102   : > { %2288 = vst [vmem:[#allocation21_spill] sm:$0xff] %v1741_v48  ;;  %2289 = vst [vmem:[#allocation22_spill] sm:$0xff] %v1743_v56  ;;  %v388_v60 = vsub.f32 %v1572_v25, %v1741_v48  ;;  %v430_v0 = vsub.f32 %v1575_v26, %v1743_v56  ;;  %v1751_v28 = vpop.eup %1081  ;;  %1091 = vpow2.f32 %v447_v43  ;;  %485 = vadd.xlane.f32.xlu1 %v484_v16  ;;  %488 = vadd.xlane.f32.xlu0 %v487_v32 }
 0x103   : > { %1093 = vpow2.f32 %v411_v59 }
 0x104   : > { %v449_v35 = vmul.f32 1.442695, %v430_v0  ;;  %v1757_v23 = vpop.eup %1083  ;;  %v413_v63 = vmul.f32 1.442695, %v388_v60  ;;  %v490_v0 = vsel %vm282_vm1, %v1751_v28, 0.0 }
 0x105   : > { %v1759_v31 = vpop.xlane.xlu1 %314  ;;  %v1761_v44 = vpop.xlane.xlu0 %344  ;;  %v493_v60 = vsel %vm282_vm1, %v1757_v23, 0.0 }
 0x106   : > { %2290 = vst [vmem:[#allocation23_spill] sm:$0xff] %v1759_v31  ;;  %2291 = vst [vmem:[#allocation24_spill] sm:$0xff] %v1761_v44  ;;  %v389_v43 = vsub.f32 %v1582_v29, %v1759_v31  ;;  %v431_v8 = vsub.f32 %v1585_v30, %v1761_v44  ;;  %1095 = vpow2.f32 %v449_v35  ;;  %v1086_v16 = vpop.eup %1085  ;;  %491 = vadd.xlane.f32.xlu1 %v490_v0  ;;  %494 = vadd.xlane.f32.xlu0 %v493_v60 }
 0x107   : > { %1097 = vpow2.f32 %v413_v63 }
 0x108   : > { %v451_v32 = vmul.f32 1.442695, %v431_v8  ;;  %v1088_v59 = vpop.eup %1087  ;;  %v415_v55 = vmul.f32 1.442695, %v389_v43  ;;  %v523_v8 = vsel %vm282_vm1, %v1086_v16, 0.0 }
 0x109   : > { %v1773_v56 = vpop.xlane.xlu1 %317  ;;  %v1775_v15 = vpop.xlane.xlu0 %347  ;;  %v526_v63 = vsel %vm282_vm1, %v1088_v59, 0.0 }
 0x10a   : > { %2292 = vst [vmem:[#allocation25_spill] sm:$0xff] %v1773_v56  ;;  %2293 = vst [vmem:[#allocation26_spill] sm:$0xff] %v1775_v15  ;;  %v390_v35 = vsub.f32 %v1592_v33, %v1773_v56  ;;  %v432_v12 = vsub.f32 %v1595_v34, %v1775_v15  ;;  %v1783_v44 = vpop.eup %1089  ;;  %1099 = vpow2.f32 %v451_v32  ;;  %524 = vadd.xlane.f32.xlu1 %v523_v8  ;;  %527 = vadd.xlane.f32.xlu0 %v526_v63 }
 0x10b   : > { %1101 = vpow2.f32 %v415_v55 }
 0x10c   : > { %v453_v0 = vmul.f32 1.442695, %v432_v12  ;;  %v1092_v43 = vpop.eup %1091  ;;  %v417_v60 = vmul.f32 1.442695, %v390_v35  ;;  %v496_v12 = vsel %vm282_vm1, %v1783_v44, 0.0 }
 0x10d   : > { %v1787_v4 = vpop.xlane.xlu1 %320  ;;  %v1789_v20 = vpop.xlane.xlu0 %350  ;;  %v529_v59 = vsel %vm282_vm1, %v1092_v43, 0.0 }
 0x10e   : > { %2294 = vst [vmem:[#allocation27_spill] sm:$0xff] %v1787_v4  ;;  %2295 = vst [vmem:[#allocation28_spill] sm:$0xff] %v1789_v20  ;;  %v391_v27 = vsub.f32 %v1602_v37, %v1787_v4  ;;  %v433_v32 = vsub.f32 %v1605_v38, %v1789_v20  ;;  %1103 = vpow2.f32 %v453_v0  ;;  %v1800_v35 = vpop.eup %1093  ;;  %497 = vadd.xlane.f32.xlu1 %v496_v12  ;;  %530 = vadd.xlane.f32.xlu0 %v529_v59 }
 0x10f   : > { %1105 = vpow2.f32 %v417_v60  ;;  %v499_v60 = vsel %vm282_vm1, %v1800_v35, 0.0 }
 0x110   : > { %v455_v8 = vmul.f32 1.442695, %v433_v32  ;;  %v1096_v55 = vpop.eup %1095  ;;  %v419_v15 = vmul.f32 1.442695, %v391_v27 }
 0x111   : > { %v1802_v63 = vpop.xlane.xlu1 %323  ;;  %v1804_v24 = vpop.xlane.xlu0 %353  ;;  %v532_v32 = vsel %vm282_vm1, %v1096_v55, 0.0 }
 0x112   : > { %2296 = vst [vmem:[#allocation29_spill] sm:$0xff] %v1802_v63  ;;  %2297 = vst [vmem:[#allocation30_spill] sm:$0xff] %v1804_v24  ;;  %v392_v0 = vsub.f32 %v1612_v41, %v1802_v63  ;;  %v434_v16 = vsub.f32 %v1615_v42, %v1804_v24  ;;  %v1812_v40 = vpop.eup %1097  ;;  %1107 = vpow2.f32 %v455_v8  ;;  %500 = vadd.xlane.f32.xlu1 %v499_v60  ;;  %533 = vadd.xlane.f32.xlu0 %v532_v32 }
 0x113   : > { %1109 = vpow2.f32 %v419_v15  ;;  %v571_v63 = vsub.f32 %v1515_v2, %v1542_v13 }
 0x114   : > { %v457_v12 = vmul.f32 1.442695, %v434_v16  ;;  %v1100_v27 = vpop.eup %1099  ;;  %v421_v59 = vmul.f32 1.442695, %v392_v0  ;;  %v502_v16 = vsel %vm282_vm1, %v1812_v40, 0.0 }
 0x115   : > { %v1817_v20 = vpop.xlane.xlu1 %326  ;;  %v1819_v5 = vpop.xlane.xlu0 %356  ;;  %v535_v55 = vsel %vm282_vm1, %v1100_v27, 0.0 }
 0x116   : > { %2298 = vst [vmem:[#allocation31_spill] sm:$0xff] %v1819_v5  ;;  %v393_v43 = vsub.f32 %v1622_v45, %v1817_v20  ;;  %v435_v8 = vsub.f32 %v1625_v46, %v1819_v5  ;;  %1111 = vpow2.f32 %v457_v12  ;;  %v1830_v0 = vpop.eup %1101  ;;  %503 = vadd.xlane.f32.xlu1 %v502_v16  ;;  %536 = vadd.xlane.f32.xlu0 %v535_v55 }
 0x117   : > { %1113 = vpow2.f32 %v421_v59  ;;  %v505_v59 = vsel %vm282_vm1, %v1830_v0, 0.0 }
 0x118   : > { %v423_v60 = vmul.f32 1.442695, %v393_v43  ;;  %v1104_v15 = vpop.eup %1103  ;;  %v459_v32 = vmul.f32 1.442695, %v435_v8 }
 0x119   : > { %v1832_v24 = vpop.xlane.xlu1 %329  ;;  %v1834_v39 = vpop.xlane.xlu0 %359  ;;  %v538_v8 = vsel %vm282_vm1, %v1104_v15, 0.0 }
 0x11a   : > { %1115 = vpow2.f32 %v423_v60  ;;  %v394_v12 = vsub.f32 %v1632_v49, %v1832_v24  ;;  %v436_v52 = vsub.f32 %v1635_v50, %v1834_v39  ;;  %v1842_v43 = vpop.eup %1105  ;;  %506 = vadd.xlane.f32.xlu1 %v505_v59  ;;  %539 = vadd.xlane.f32.xlu0 %v538_v8 }
 0x11b   : > { %1117 = vpow2.f32 %v459_v32 }
 0x11c   : > { %v425_v16 = vmul.f32 1.442695, %v394_v12  ;;  %v461_v55 = vmul.f32 1.442695, %v436_v52  ;;  %v1108_v60 = vpop.eup %1107  ;;  %v508_v52 = vsel %vm282_vm1, %v1842_v43, 0.0 }
 0x11d   : > { %v1847_v19 = vpop.xlane.xlu1 %365  ;;  %v1849_v5 = vpop.xlane.xlu0 %362  ;;  %v541_v12 = vsel %vm282_vm1, %v1108_v60, 0.0 }
 0x11e   : > { %2299 = vst [vmem:[#allocation32_spill] sm:$0xff] %v1847_v19  ;;  %2300 = vst [vmem:[#allocation33_spill] sm:$0xff] %v1849_v5  ;;  %v437_v48 = vsub.f32 %v1645_v54, %v1849_v5  ;;  %1119 = vpow2.f32 %v461_v55  ;;  %v1860_v59 = vpop.eup %1109  ;;  %v438_v32 = vsub.f32 %v1642_v53, %v1847_v19  ;;  %509 = vadd.xlane.f32.xlu1 %v508_v52  ;;  %542 = vadd.xlane.f32.xlu0 %v541_v12 }
 0x11f   : > { %1121 = vpow2.f32 %v425_v16  ;;  %v511_v16 = vsel %vm282_vm1, %v1860_v59, 0.0  ;;  %v573_v5 = vsub.f32 %v1512_v1, %v1565_v22 }
 0x120   : > { %v463_v8 = vmul.f32 1.442695, %v437_v48  ;;  %v1112_v27 = vpop.eup %1111  ;;  %v465_v12 = vmul.f32 1.442695, %v438_v32 }
 0x121   : > { %v1864_v56 = vpop.xlane.xlu1 %371  ;;  %v1866_v55 = vpop.xlane.xlu0 %368  ;;  %v544_v48 = vsel %vm282_vm1, %v1112_v27, 0.0 }
 0x122   : > { %2301 = vst [vmem:[#allocation34_spill] sm:$0xff] %v1866_v55  ;;  %v1870_v31 = vpop.eup %1113  ;;  %1123 = vpow2.f32 %v463_v8  ;;  %v439_v19 = vsub.f32 %v1655_v58, %v1866_v55  ;;  %512 = vadd.xlane.f32.xlu1 %v511_v16  ;;  %545 = vadd.xlane.f32.xlu0 %v544_v48  ;;  %v587_v55 = vmul.f32 %v1705_v51, %v571_v63 }
 0x123   : > { %v514_v60 = vsel %vm282_vm1, %v1870_v31, 0.0  ;;  %1125 = vpow2.f32 %v465_v12 }
 0x124   : > { %v1877_v52 = vpop.eup %1115  ;;  %v467_v27 = vmul.f32 1.442695, %v439_v19  ;;  %v603_v19 = vsel %vm282_vm1, %v587_v55, 0.0 }
 0x125   : > { %v517_v15 = vsel %vm282_vm1, %v1877_v52, 0.0  ;;  %v1118_v4 = vpop.eup %1117  ;;  %v1903_v51 = vpop.xlane.xlu0 %374 }
 0x126   : > { %515 = vadd.xlane.f32.xlu1 %v514_v60  ;;  %518 = vadd.xlane.f32.xlu0 %v517_v15  ;;  %v547_v48 = vsel %vm282_vm1, %v1118_v4, 0.0  ;;  %1127 = vpow2.f32 %v467_v27  ;;  %v589_v15 = vmul.f32 %v1719_v7, %v573_v5  ;;  %v575_v60 = vsub.f32 %v1535_v10, %v1585_v30  ;;  %v1912_v27 = vpop.xlane.xlu1 %377 }
 0x127   : > { %v440_v4 = vsub.f32 %v1652_v57, %v1864_v56  ;;  %v576_v5 = vsub.f32 %v1532_v9, %v1595_v34  ;;  %v441_v10 = vsub.f32 %v1665_v62, %v1903_v51  ;;  %v572_v9 = vsub.f32 %v1525_v6, %v1555_v18 }
 0x128   : > { %v1120_v32 = vpop.eup %1119  ;;  %v609_v63 = vsel %vm282_vm1, %v589_v15, 0.0  ;;  %v591_v12 = vmul.f32 %v1739_v47, %v575_v60  ;;  %v577_v47 = vsub.f32 %v1545_v14, %v1605_v38  ;;  %v442_v34 = vsub.f32 %v1662_v61, %v1912_v27 }
 0x129   : > { %v1887_v8 = vpop.eup %1121  ;;  %v550_v16 = vsel %vm282_vm1, %v1120_v32, 0.0  ;;  %v469_v7 = vmul.f32 1.442695, %v440_v4  ;;  %v588_v14 = vmul.f32 %v1721_v11, %v572_v9  ;;  %v578_v6 = vsub.f32 %v1552_v17, %v1615_v42 }
 0x12a   : > { %548 = vadd.xlane.f32.xlu1 %v547_v48  ;;  %551 = vadd.xlane.f32.xlu0 %v550_v16  ;;  %v520_v2 = vsel %vm282_vm1, %v1887_v8, 0.0  ;;  %v615_v32 = vsel %vm282_vm1, %v591_v12, 0.0  ;;  %v592_v16 = vmul.f32 %v1751_v28, %v576_v5  ;;  %v471_v48 = vmul.f32 1.442695, %v441_v10 }
 0x12b   : > { %1129 = vpow2.f32 %v469_v7  ;;  %v473_v18 = vmul.f32 1.442695, %v442_v34  ;;  %v579_v38 = vsub.f32 %v1562_v21, %v1625_v46  ;;  %v580_v21 = vsub.f32 %v1572_v25, %v1635_v50 }
 0x12c   : > { %v1124_v13 = vpop.eup %1123  ;;  %v618_v28 = vsel %vm282_vm1, %v592_v16, 0.0  ;;  %1131 = vpow2.f32 %v471_v48  ;;  %v583_v50 = vsub.f32 %v1602_v37, %v1655_v58  ;;  %v582_v12 = vsub.f32 %v1592_v33, %v1642_v53 }
 0x12d   : > { %v553_v1 = vsel %vm282_vm1, %v1124_v13, 0.0  ;;  %v1126_v22 = vpop.eup %1125  ;;  %v574_v13 = vsub.f32 %v1518_v3, %v1575_v26  ;;  %v606_v3 = vsel %vm282_vm1, %v588_v14, 0.0  ;;  %v594_v26 = vmul.f32 %v1783_v44, %v578_v6 }
 0x12e   : > { %521 = vadd.xlane.f32.xlu1 %v520_v2  ;;  %604 = vadd.xlane.f32.xlu0 %v603_v19  ;;  %v556_v30 = vsel %vm282_vm1, %v1126_v22, 0.0  ;;  %v593_v19 = vmul.f32 %v1757_v23, %v577_v47  ;;  %1133 = vpow2.f32 %v473_v18  ;;  %v595_v60 = vmul.f32 %v1800_v35, %v579_v38 }
 0x12f   : > { %v590_v23 = vmul.f32 %v1737_v36, %v574_v13  ;;  %v624_v17 = vsel %vm282_vm1, %v594_v26, 0.0  ;;  %v596_v4 = vmul.f32 %v1812_v40, %v580_v21  ;;  %v599_v5 = vmul.f32 %v1860_v59, %v583_v50 }
 0x130   : > { %v1128_v55 = vpop.eup %1127  ;;  %v621_v15 = vsel %vm282_vm1, %v593_v19, 0.0  ;;  %v627_v36 = vsel %vm282_vm1, %v595_v60, 0.0  ;;  %v598_v7 = vmul.f32 %v1842_v43, %v582_v12  ;;  %v586_v33 = vsub.f32 %v1632_v49, %v1662_v61 }
 0x131   : > { %v559_v2 = vsel %vm282_vm1, %v1128_v55, 0.0  ;;  %v612_v42 = vsel %vm282_vm1, %v590_v23, 0.0  ;;  %v639_v37 = vsel %vm282_vm1, %v599_v5, 0.0 }
 0x132   : > { %610 = vadd.xlane.f32.xlu0 %v609_v63  ;;  %554 = vadd.xlane.f32.xlu1 %v553_v1  ;;  %v581_v1 = vsub.f32 %v1582_v29, %v1645_v54  ;;  %v630_v63 = vsel %vm282_vm1, %v596_v4, 0.0  ;;  %v584_v29 = vsub.f32 %v1612_v41, %v1652_v57  ;;  %v636_v53 = vsel %vm282_vm1, %v598_v7, 0.0 }
 0x134   : > { %v597_v25 = vmul.f32 %v1830_v0, %v581_v1  ;;  %v585_v0 = vsub.f32 %v1622_v45, %v1665_v62  ;;  %v600_v57 = vmul.f32 %v1870_v31, %v584_v29  ;;  %v602_v45 = vmul.f32 %v1887_v8, %v586_v33 }
 0x135   : > { %v1130_v11 = vpop.eup %1129 }
 0x136   : > { %616 = vadd.xlane.f32.xlu0 %v615_v32  ;;  %557 = vadd.xlane.f32.xlu1 %v556_v30  ;;  %v562_v46 = vsel %vm282_vm1, %v1130_v11, 0.0  ;;  %v1132_v44 = vpop.eup %1131  ;;  %v633_v54 = vsel %vm282_vm1, %v597_v25, 0.0  ;;  %v601_v41 = vmul.f32 %v1877_v52, %v585_v0  ;;  %v642_v43 = vsel %vm282_vm1, %v600_v57, 0.0 }
 0x137   : > { %v565_v22 = vsel %vm282_vm1, %v1132_v44, 0.0  ;;  %v648_v49 = vsel %vm282_vm1, %v602_v45, 0.0  ;;  %v698_v0 = vsub.f32 %v1912_v27, %v1832_v24 }
 0x138   : > { %v1134_v35 = vpop.eup %1133  ;;  %v645_v58 = vsel %vm282_vm1, %v601_v41, 0.0 }
 0x139   : > { %v568_v40 = vsel %vm282_vm1, %v1134_v35, 0.0 }
 0x13a   : > { %619 = vadd.xlane.f32.xlu0 %v618_v28  ;;  %560 = vadd.xlane.f32.xlu1 %v559_v2 }
 0x13e   : > { %622 = vadd.xlane.f32.xlu0 %v621_v15  ;;  %607 = vadd.xlane.f32.xlu1 %v606_v3 }
 0x142   : > { %625 = vadd.xlane.f32.xlu0 %v624_v17  ;;  %613 = vadd.xlane.f32.xlu1 %v612_v42  ;;  %v779_v42 = vlaneseq }
 0x146   : > { %628 = vadd.xlane.f32.xlu0 %v627_v36  ;;  %563 = vadd.xlane.f32.xlu1 %v562_v46 }
 0x14a   : > { %631 = vadd.xlane.f32.xlu0 %v630_v63  ;;  %566 = vadd.xlane.f32.xlu1 %v565_v22  ;;  %v1992_v63 = vshrl.u32 %v779_v42, 7 }
 0x14c   : > { %v782_v29 = vadd.s32 16, %v1992_v63  ;;  %v781_v7 = vadd.s32 8, %v1992_v63  ;;  %v785_v57 = vadd.s32 40, %v1992_v63 }
 0x14e   : > { %634 = vadd.xlane.f32.xlu0 %v633_v54  ;;  %569 = vadd.xlane.f32.xlu1 %v568_v40  ;;  %v2000_v40 = vstv %s1000_s27 }
 0x14f   : > { %v2010_v33 = vadd.s32 %v2000_v40, %v1992_v63  ;;  %v2016_v41 = vadd.s32 %v2000_v40, %v782_v29 }
 0x151   : > { %vm813_vm2 = vcmp.lt.s32.totalorder %v2010_v33, 256  ;;  %vm815_vm3 = vcmp.lt.s32.totalorder %v2016_v41, 256 }
 0x152   : > { %640 = vadd.xlane.f32.xlu0 %v639_v37  ;;  %637 = vadd.xlane.f32.xlu1 %v636_v53  ;;  %v784_v37 = vadd.s32 32, %v1992_v63  ;;  %v697_v53 = vsub.f32 %v1903_v51, %v1817_v20 }
 0x156   : > { %646 = vadd.xlane.f32.xlu0 %v645_v58  ;;  %643 = vadd.xlane.f32.xlu1 %v642_v43 }
 0x15a   : > { %649 = vadd.xlane.f32.xlu1 %v648_v49  ;;  %v2024_v49 = vadd.s32 %v2000_v40, %v781_v7 }
 0x15c   : > { %vm814_vm4 = vcmp.lt.s32.totalorder %v2024_v49, 256 }
 0x187   : > { %v477_v61 = vpop.xlane.xlu0 %476 }
 0x188   : > { %1135 = vrcp.f32 %v477_v61  ;;  %v786_v61 = vadd.s32 48, %v1992_v63 }
 0x18b   : > { %v480_v62 = vpop.xlane.xlu1 %479  ;;  %v483_v59 = vpop.xlane.xlu0 %482 }
 0x18c   : > { %1137 = vrcp.f32 %v480_v62  ;;  %v783_v62 = vadd.s32 24, %v1992_v63 }
 0x18d   : > { %1139 = vrcp.f32 %v483_v59 }
 0x18f   : > { %v486_v10 = vpop.xlane.xlu1 %485  ;;  %v489_v52 = vpop.xlane.xlu0 %488 }
 0x190   : > { %1141 = vrcp.f32 %v486_v10 }
 0x191   : > { %1143 = vrcp.f32 %v489_v52 }
 0x192   : > { %v1136_v15 = vpop.eup %1135 }
 0x193   : > { %v492_v30 = vpop.xlane.xlu1 %491  ;;  %v495_v31 = vpop.xlane.xlu0 %494 }
 0x194   : > { %1145 = vrcp.f32 %v492_v30  ;;  %v787_v30 = vadd.s32 56, %v1992_v63 }
 0x195   : > { %1147 = vrcp.f32 %v495_v31 }
 0x196   : > { %v1977_v3 = vpop.eup %1137 }
 0x197   : > { %v525_v55 = vpop.xlane.xlu1 %524  ;;  %v528_v32 = vpop.xlane.xlu0 %527 }
 0x198   : > { %v715_v26 = vmul.f32 %v1136_v15, %v525_v55  ;;  %v716_v17 = vmul.f32 %v1977_v3, %v528_v32  ;;  %v1140_v60 = vpop.eup %1139  ;;  %v2034_v32 = vadd.s32 %v2000_v40, %v784_v37 }
 0x19a   : > { %v1982_v21 = vpop.eup %1141  ;;  %vm817_vm6 = vcmp.lt.s32.totalorder %v2034_v32, 256 }
 0x19b   : > { %v498_v16 = vpop.xlane.xlu1 %497  ;;  %v531_v47 = vpop.xlane.xlu0 %530 }
 0x19c   : > { %1149 = vrcp.f32 %v498_v16  ;;  %v717_v46 = vmul.f32 %v1140_v60, %v531_v47  ;;  %v1984_v44 = vpop.eup %1143  ;;  %v788_v16 = vadd.s32 64, %v1992_v63  ;;  %v789_v47 = vadd.s32 72, %v1992_v63 }
 0x19d   : > { %1151 = vlog2.f32 %v715_v26 }
 0x19e   : > { %v1989_v22 = vpop.eup %1145  ;;  %v2068_v29 = vadd.s32 %v2000_v40, %v788_v16 }
 0x19f   : > { %v501_v9 = vpop.xlane.xlu1 %500  ;;  %v534_v34 = vpop.xlane.xlu0 %533 }
 0x1a0   : > { %1153 = vrcp.f32 %v501_v9  ;;  %v718_v36 = vmul.f32 %v1982_v21, %v534_v34  ;;  %v1994_v25 = vpop.eup %1147  ;;  %vm821_vm11 = vcmp.lt.s32.totalorder %v2068_v29, 256 }
 0x1a1   : > { %1155 = vlog2.f32 %v716_v17  ;;  %v2303_v17 = vld [vmem:[#allocation10_spill] sm:$0xff] }
 0x1a3   : > { %v504_v48 = vpop.xlane.xlu1 %503  ;;  %v537_v8 = vpop.xlane.xlu0 %536 }
 0x1a4   : > { %v719_v35 = vmul.f32 %v1984_v44, %v537_v8  ;;  %1157 = vrcp.f32 %v504_v48  ;;  %v2042_v48 = vadd.s32 %v2000_v40, %v785_v57  ;;  %v790_v8 = vadd.s32 80, %v1992_v63 }
 0x1a5   : > { %1159 = vlog2.f32 %v717_v46  ;;  %v2061_v46 = vadd.s32 %v2000_v40, %v787_v30 }
 0x1a6   : > { %1161 = vlog2.f32 %v718_v36  ;;  %v2019_v58 = vpop.eup %1149  ;;  %v2075_v57 = vadd.s32 %v2000_v40, %v790_v8  ;;  %vm818_vm8 = vcmp.lt.s32.totalorder %v2042_v48, 256 }
 0x1a7   : > { %v507_v2 = vpop.xlane.xlu1 %506  ;;  %v540_v13 = vpop.xlane.xlu0 %539  ;;  %1163 = vlog2.f32 %v719_v35  ;;  %v2306_v35 = vld [vmem:[#allocation9_spill] sm:$0xff]  ;;  %vm820_vm10 = vcmp.lt.s32.totalorder %v2061_v46, 256  ;;  %v793_v46 = vadd.s32 104, %v1992_v63 }
 0x1a8   : > { %v720_v50 = vmul.f32 %v1989_v22, %v540_v13  ;;  %v1152_v59 = vpop.eup %1151  ;;  %vm823_vm13 = vcmp.lt.s32.totalorder %v2075_v57, 256 }
 0x1a9   : > { %v732_v7 = vmul.f32 0.6931472, %v1152_v59  ;;  %v2084_v59 = vadd.s32 96, %v1992_v63 }
 0x1aa   : > { %1165 = vlog2.f32 %v720_v50  ;;  %v2030_v31 = vpop.eup %1153 }
 0x1ab   : > { %v510_v28 = vpop.xlane.xlu1 %509  ;;  %v543_v19 = vpop.xlane.xlu0 %542 }
 0x1ac   : > { %v721_v12 = vmul.f32 %v1994_v25, %v543_v19  ;;  %v1156_v9 = vpop.eup %1155  ;;  %v2049_v19 = vadd.s32 %v2000_v40, %v786_v61 }
 0x1ae   : > { %1167 = vlog2.f32 %v721_v12  ;;  %vm819_vm9 = vcmp.lt.s32.totalorder %v2049_v19, 256 }
 0x1af   : > { %v1971_v14 = vpop.xlane.xlu1 %512  ;;  %v546_v6 = vpop.xlane.xlu0 %545  ;;  %1169 = vrcp.f32 %v507_v2 }
 0x1b0   : > { %1171 = vrcp.f32 %v510_v28  ;;  %v722_v10 = vmul.f32 %v2019_v58, %v546_v6  ;;  %v2045_v2 = vpop.eup %1157  ;;  %v791_v6 = vadd.s32 88, %v1992_v63 }
 0x1b1   : > { %1173 = vrcp.f32 %v1971_v14  ;;  %v2052_v14 = vadd.s32 %v2000_v40, %v783_v62 }
 0x1b2   : > { %1175 = vlog2.f32 %v722_v10  ;;  %v2081_v30 = vadd.s32 %v2000_v40, %v791_v6 }
 0x1b3   : > { %v1973_v18 = vpop.xlane.xlu1 %515  ;;  %v1975_v38 = vpop.xlane.xlu0 %518  ;;  %vm816_vm7 = vcmp.lt.s32.totalorder %v2052_v14, 256 }
 0x1b4   : > { %1177 = vrcp.f32 %v1973_v18  ;;  %vm824_vm14 = vcmp.lt.s32.totalorder %v2081_v30, 256 }
 0x1b7   : > { %v549_v23 = vpop.xlane.xlu1 %548  ;;  %v1979_v11 = vpop.xlane.xlu0 %551 }
 0x1b8   : > { %v723_v34 = vmul.f32 %v2030_v31, %v549_v23  ;;  %v724_v26 = vmul.f32 %v2045_v2, %v1979_v11  ;;  %v2302_v23 = vld [vmem:[#allocation15_spill] sm:$0xff]  ;;  %v2071_v11 = vadd.s32 %v2000_v40, %v789_v47 }
 0x1b9   : > { %v2304_v42 = vsub.f32 %v2302_v23, %v2303_v17 }
 0x1ba   : > { %1179 = vlog2.f32 %v723_v34  ;;  %vm822_vm12 = vcmp.lt.s32.totalorder %v2071_v11, 256 }
 0x1bb   : > { %v1987_v4 = vpop.xlane.xlu1 %521  ;;  %v605_v1 = vpop.xlane.xlu0 %604  ;;  %1181 = vlog2.f32 %v724_v26  ;;  %v2309_v26 = vld [vmem:[#allocation14_spill] sm:$0xff] }
 0x1bc   : > { %v652_v52 = vmul.f32 %v1136_v15, %v605_v1  ;;  %v1160_v15 = vpop.eup %1159  ;;  %v2305_v1 = vld [vmem:[#allocation20_spill] sm:$0xff]  ;;  %1183 = vrcp.f32 %v1975_v38 }
 0x1bd   : > { %v1162_v36 = vpop.eup %1161  ;;  %v2307_v50 = vsub.f32 %v2305_v1, %v2306_v35  ;;  %v736_v18 = vmul.f32 0.6931472, %v1160_v15  ;;  %v2308_v15 = vld [vmem:[#allocation24_spill] sm:$0xff]  ;;  %v2314_v35 = vld [vmem:[#allocation26_spill] sm:$0xff]  ;;  %1185 = vrcp.f32 %v1987_v4 }
 0x1be   : > { %v2310_v23 = vsub.f32 %v2308_v15, %v2309_v26 }
 0x1bf   : > { %v2003_v54 = vpop.xlane.xlu1 %554  ;;  %v611_v5 = vpop.xlane.xlu0 %610 }
 0x1c0   : > { %v656_v55 = vmul.f32 %v1140_v60, %v611_v5  ;;  %v699_v60 = vadd.f32 %v2304_v42, %v652_v52  ;;  %v1164_v5 = vpop.eup %1163  ;;  %v2311_v42 = vld [vmem:[#allocation18_spill] sm:$0xff] }
 0x1c1   : > { %v1166_v61 = vpop.eup %1165  ;;  %v740_v6 = vmul.f32 0.6931472, %v1164_v5 }
 0x1c2   : > { %v701_v12 = vadd.f32 %v2307_v50, %v656_v55  ;;  %v763_v55 = vadd.f32 %v732_v7, %v699_v60  ;;  %v742_v38 = vmul.f32 0.6931472, %v1166_v61  ;;  %v2315_v50 = vld [vmem:[#allocation13_spill] sm:$0xff] }
 0x1c3   : > { %v2021_v43 = vpop.xlane.xlu1 %557  ;;  %v617_v45 = vpop.xlane.xlu0 %616 }
 0x1c4   : > { %v660_v37 = vmul.f32 %v1984_v44, %v617_v45  ;;  %v1168_v44 = vpop.eup %1167  ;;  %v734_v45 = vmul.f32 0.6931472, %v1156_v9  ;;  %v765_v34 = vadd.f32 %v736_v18, %v701_v12  ;;  %v2316_v12 = vsub.f32 %v2314_v35, %v2315_v50 }
 0x1c5   : > { %v2088_v47 = vpop.eup %1169 }
 0x1c6   : > { %v725_v9 = vmul.f32 %v2088_v47, %v2003_v54  ;;  %v703_v17 = vadd.f32 %v2310_v23, %v660_v37  ;;  %v829_v37 = vsel %vm813_vm2, %v763_v55, 0.0  ;;  %v2321_v55 = vld [vmem:[#allocation11_spill] sm:$0xff] }
 0x1c7   : > { %v561_v13 = vpop.xlane.xlu1 %560  ;;  %v620_v28 = vpop.xlane.xlu0 %619 }
 0x1c8   : > { %v662_v62 = vmul.f32 %v1989_v22, %v620_v28  ;;  %v738_v22 = vmul.f32 0.6931472, %v1162_v36  ;;  %v2092_v28 = vpop.eup %1171  ;;  %v744_v36 = vmul.f32 0.6931472, %v1168_v44  ;;  %1187 = vlog2.f32 %v725_v9 }
 0x1c9   : > { %v2108_v18 = vpop.eup %1173 }
 0x1ca   : > { %v704_v5 = vadd.f32 %v2316_v12, %v662_v62  ;;  %v727_v44 = vmul.f32 %v2108_v18, %v561_v13  ;;  %v2317_v62 = vld [vmem:[#allocation28_spill] sm:$0xff]  ;;  %v1176_v33 = vpop.eup %1175  ;;  %v847_v13 = vsel %vm846_vm5, %v829_v37, 0.0 }
 0x1cb   : > { %v608_v10 = vpop.xlane.xlu1 %607  ;;  %v623_v52 = vpop.xlane.xlu0 %622 }
 0x1cc   : > { %v654_v16 = vmul.f32 %v1977_v3, %v608_v10  ;;  %v664_v8 = vmul.f32 %v1994_v25, %v623_v52  ;;  %v2312_v3 = vld [vmem:[#allocation12_spill] sm:$0xff]  ;;  %v726_v25 = vmul.f32 %v2092_v28, %v2021_v43  ;;  %v831_v43 = vsel %vm815_vm3, %v765_v34, 0.0  ;;  %v2127_v41 = vpop.eup %1177 }
 0x1cd   : > { %v2313_v60 = vsub.f32 %v2311_v42, %v2312_v3  ;;  %v768_v34 = vadd.f32 %v742_v38, %v704_v5  ;;  %v746_v5 = vmul.f32 0.6931472, %v1176_v33 }
 0x1ce   : > { %1189 = vlog2.f32 %v726_v25 }
 0x1cf   : > { %v700_v1 = vadd.f32 %v2313_v60, %v654_v16  ;;  %v614_v54 = vpop.xlane.xlu1 %613  ;;  %v626_v7 = vpop.xlane.xlu0 %625  ;;  %v2318_v16 = vld [vmem:[#allocation16_spill] sm:$0xff]  ;;  %1191 = vlog2.f32 %v727_v44  ;;  %v2327_v44 = vld [vmem:[#allocation19_spill] sm:$0xff] }
 0x1d0   : > { %v658_v52 = vmul.f32 %v1982_v21, %v614_v54  ;;  %v666_v61 = vmul.f32 %v2019_v58, %v626_v7  ;;  %v2319_v15 = vsub.f32 %v2317_v62, %v2318_v16  ;;  %v2320_v58 = vld [vmem:[#allocation22_spill] sm:$0xff]  ;;  %v1180_v60 = vpop.eup %1179 }
 0x1d1   : > { %v764_v10 = vadd.f32 %v734_v45, %v700_v1  ;;  %v767_v45 = vadd.f32 %v740_v6, %v703_v17  ;;  %v2322_v4 = vsub.f32 %v2320_v58, %v2321_v55  ;;  %v850_v6 = vsel %vm846_vm5, %v831_v43, 0.0  ;;  %v2323_v17 = vld [vmem:[#allocation30_spill] sm:$0xff]  ;;  %v2324_v1 = vld [vmem:[#allocation17_spill] sm:$0xff]  ;;  %v1182_v38 = vpop.eup %1181  ;;  %v2326_v43 = vld [vmem:[#allocation31_spill] sm:$0xff] }
 0x1d2   : > { %v705_v26 = vadd.f32 %v2319_v15, %v664_v8  ;;  %v2325_v35 = vsub.f32 %v2323_v17, %v2324_v1  ;;  %v809_v1 = vadd.s32 %v2000_v40, %v2084_v59 }
 0x1d3   : > { %v830_v21 = vsel %vm814_vm4, %v764_v10, 0.0  ;;  %v702_v23 = vadd.f32 %v2322_v4, %v658_v52  ;;  %v564_v42 = vpop.xlane.xlu1 %563  ;;  %v629_v3 = vpop.xlane.xlu0 %628  ;;  %v833_v7 = vsel %vm817_vm6, %v767_v45, 0.0  ;;  %v748_v52 = vmul.f32 0.6931472, %v1180_v60  ;;  %v2329_v4 = vld [vmem:[#allocation21_spill] sm:$0xff] }
 0x1d4   : > { %v848_v8 = vsel %vm846_vm5, %v830_v21, 0.0  ;;  %v706_v50 = vadd.f32 %v2325_v35, %v666_v61  ;;  %v769_v12 = vadd.f32 %v744_v36, %v705_v26  ;;  %v728_v54 = vmul.f32 %v2127_v41, %v564_v42 }
 0x1d5   : > { %v849_v9 = vadd.f32 %v848_v8, %v847_v13  ;;  %v766_v49 = vadd.f32 %v738_v22, %v702_v23  ;;  %v668_v25 = vmul.f32 %v2030_v31, %v629_v3  ;;  %v2141_v22 = vpop.eup %1183  ;;  %v834_v61 = vsel %vm818_vm8, %v768_v34, 0.0 }
 0x1d6   : > { %v2328_v31 = vsub.f32 %v2326_v43, %v2327_v44  ;;  %v770_v26 = vadd.f32 %v746_v5, %v706_v50  ;;  %v750_v45 = vmul.f32 0.6931472, %v1182_v38  ;;  %v854_v21 = vsel %vm846_vm5, %v833_v7, 0.0  ;;  %v2157_v34 = vpop.eup %1185  ;;  %v2331_v38 = vld [vmem:[#allocation33_spill] sm:$0xff]  ;;  %v2332_v5 = vld [vmem:[#allocation23_spill] sm:$0xff] }
 0x1d7   : > { %v832_v37 = vsel %vm816_vm7, %v766_v49, 0.0  ;;  %v851_v10 = vadd.f32 %v850_v6, %v849_v9  ;;  %v567_v16 = vpop.xlane.xlu1 %566  ;;  %v632_v15 = vpop.xlane.xlu0 %631  ;;  %v835_v48 = vsel %vm819_vm9, %v769_v12, 0.0  ;;  %1193 = vlog2.f32 %v728_v54 }
 0x1d8   : > { %v852_v36 = vsel %vm846_vm5, %v832_v37, 0.0  ;;  %v707_v62 = vadd.f32 %v2328_v31, %v668_v25  ;;  %v729_v14 = vmul.f32 %v2141_v22, %v567_v16  ;;  %v670_v33 = vmul.f32 %v2045_v2, %v632_v15  ;;  %v1188_v42 = vpop.eup %1187 }
 0x1d9   : > { %v853_v32 = vadd.f32 %v852_v36, %v851_v10  ;;  %v2330_v23 = vsub.f32 %v1834_v39, %v2329_v4  ;;  %v856_v8 = vsel %vm846_vm5, %v834_v61, 0.0  ;;  %v836_v60 = vsel %vm820_vm10, %v770_v26, 0.0  ;;  %v1190_v9 = vpop.eup %1189  ;;  %v2335_v26 = vld [vmem:[#allocation25_spill] sm:$0xff] }
 0x1da   : > { %v771_v55 = vadd.f32 %v748_v52, %v707_v62  ;;  %1195 = vlog2.f32 %v729_v14  ;;  %v858_v49 = vsel %vm846_vm5, %v835_v48, 0.0  ;;  %v1192_v12 = vpop.eup %1191  ;;  %v752_v54 = vmul.f32 0.6931472, %v1188_v42 }
 0x1db   : > { %v855_v58 = vadd.f32 %v854_v21, %v853_v32  ;;  %v708_v13 = vadd.f32 %v2330_v23, %v670_v33  ;;  %v570_v2 = vpop.xlane.xlu1 %569  ;;  %v635_v19 = vpop.xlane.xlu0 %634  ;;  %v860_v25 = vsel %vm846_vm5, %v836_v60, 0.0  ;;  %v2333_v7 = vsub.f32 %v2331_v38, %v2332_v5  ;;  %v2334_v32 = vld [vmem:[#allocation32_spill] sm:$0xff]  ;;  %v2338_v21 = vld [vmem:[#allocation27_spill] sm:$0xff] }
 0x1dc   : > { %v730_v39 = vmul.f32 %v2157_v34, %v570_v2  ;;  %v672_v17 = vmul.f32 %v2088_v47, %v635_v19  ;;  %v837_v50 = vsel %vm821_vm11, %v771_v55, 0.0  ;;  %v794_v52 = vadd.s32 112, %v1992_v63 }
 0x1dd   : > { %v857_v3 = vadd.f32 %v856_v8, %v855_v58  ;;  %v772_v6 = vadd.f32 %v750_v45, %v708_v13  ;;  %v754_v43 = vmul.f32 0.6931472, %v1190_v9  ;;  %v862_v44 = vsel %vm846_vm5, %v837_v50, 0.0  ;;  %v2337_v45 = vld [vmem:[#allocation34_spill] sm:$0xff] }
 0x1de   : > { %1197 = vlog2.f32 %v730_v39  ;;  %v709_v47 = vadd.f32 %v2333_v7, %v672_v17  ;;  %v795_v62 = vadd.s32 120, %v1992_v63  ;;  %v756_v16 = vmul.f32 0.6931472, %v1192_v12 }
 0x1df   : > { %v859_v35 = vadd.f32 %v858_v49, %v857_v3  ;;  %v638_v37 = vpop.xlane.xlu1 %637  ;;  %v641_v10 = vpop.xlane.xlu0 %640  ;;  %v838_v29 = vsel %vm822_vm12, %v772_v6, 0.0  ;;  %v2336_v14 = vsub.f32 %v2334_v32, %v2335_v26  ;;  %v2339_v11 = vsub.f32 %v2337_v45, %v2338_v21 }
 0x1e0   : > { %v674_v61 = vmul.f32 %v2092_v28, %v638_v37  ;;  %v676_v36 = vmul.f32 %v2108_v18, %v641_v10  ;;  %v773_v31 = vadd.f32 %v752_v54, %v709_v47  ;;  %v864_v28 = vsel %vm846_vm5, %v838_v29, 0.0 }
 0x1e1   : > { %v861_v59 = vadd.f32 %v860_v25, %v859_v35  ;;  %v1194_v58 = vpop.eup %1193  ;;  %vm825_vm15 = vcmp.lt.s32.totalorder %v809_v1, 256  ;;  %v810_v55 = vadd.s32 %v2000_v40, %v793_v46  ;;  %v811_v19 = vadd.s32 %v2000_v40, %v794_v52  ;;  %v2340_v35 = vld [vmem:[#allocation29_spill] sm:$0xff] }
 0x1e2   : > { %v710_v33 = vadd.f32 %v2336_v14, %v674_v61  ;;  %v711_v48 = vadd.f32 %v2339_v11, %v676_v36  ;;  %v839_v18 = vsel %vm823_vm13, %v773_v31, 0.0  ;;  %v812_v49 = vadd.s32 %v2000_v40, %v795_v62  ;;  %v845_v31 = vld [vmem:[#allocation2] sm:$0x1] }
 0x1e3   : > { %v863_v15 = vadd.f32 %v862_v44, %v861_v59  ;;  %v644_v63 = vpop.xlane.xlu1 %643  ;;  %v647_v4 = vpop.xlane.xlu0 %646  ;;  %v866_v3 = vsel %vm846_vm5, %v839_v18, 0.0  ;;  %v758_v17 = vmul.f32 0.6931472, %v1194_v58  ;;  %v2341_v50 = vsub.f32 %v1864_v56, %v2340_v35 }
 0x1e4   : > { %v1196_v23 = vpop.eup %1195  ;;  %v774_v8 = vadd.f32 %v754_v43, %v710_v33  ;;  %v775_v2 = vadd.f32 %v756_v16, %v711_v48  ;;  %v678_v60 = vmul.f32 %v2127_v41, %v644_v63  ;;  %v680_v6 = vmul.f32 %v2141_v22, %v647_v4 }
 0x1e5   : > { %v865_v13 = vadd.f32 %v864_v28, %v863_v15  ;;  %v760_v42 = vmul.f32 0.6931472, %v1196_v23  ;;  %vm826_vm1 = vcmp.lt.s32.totalorder %v810_v55, 256  ;;  %vm827_vm2 = vcmp.lt.s32.totalorder %v811_v19, 256 }
 0x1e6   : > { %v840_v39 = vsel %vm824_vm14, %v774_v8, 0.0  ;;  %v841_v9 = vsel %vm825_vm15, %v775_v2, 0.0  ;;  %v712_v46 = vadd.f32 %v2341_v50, %v678_v60  ;;  %v713_v41 = vadd.f32 %v697_v53, %v680_v6 }
 0x1e7   : > { %v867_v57 = vadd.f32 %v866_v3, %v865_v13  ;;  %v868_v1 = vsel %vm846_vm5, %v840_v39, 0.0  ;;  %v650_v12 = vpop.xlane.xlu1 %649  ;;  %v870_v40 = vsel %vm846_vm5, %v841_v9, 0.0  ;;  %vm828_vm3 = vcmp.lt.s32.totalorder %v812_v49, 256 }
 0x1e8   : > { %v1198_v22 = vpop.eup %1197  ;;  %v682_v30 = vmul.f32 %v2157_v34, %v650_v12  ;;  %v776_v38 = vadd.f32 %v758_v17, %v712_v46  ;;  %v777_v5 = vadd.f32 %v760_v42, %v713_v41 }
 0x1e9   : > { %v869_v54 = vadd.f32 %v868_v1, %v867_v57  ;;  %v762_v25 = vmul.f32 0.6931472, %v1198_v22 }
 0x1ea   : > { %v714_v56 = vadd.f32 %v698_v0, %v682_v30  ;;  %v842_v47 = vsel %vm826_vm1, %v776_v38, 0.0  ;;  %v843_v20 = vsel %vm827_vm2, %v777_v5, 0.0 }
 0x1eb   : > { %v871_v7 = vadd.f32 %v870_v40, %v869_v54  ;;  %v872_v53 = vsel %vm846_vm5, %v842_v47, 0.0  ;;  %v874_v34 = vsel %vm846_vm5, %v843_v20, 0.0 }
 0x1ec   : > { %v778_v51 = vadd.f32 %v762_v25, %v714_v56 }
 0x1ed   : > { %v873_v37 = vadd.f32 %v872_v53, %v871_v7 }
 0x1ee   : > { %v844_v10 = vsel %vm828_vm3, %v778_v51, 0.0 }
 0x1ef   : > { %v875_v52 = vadd.f32 %v874_v34, %v873_v37  ;;  %v876_v59 = vsel %vm846_vm5, %v844_v10, 0.0 }
 0x1f1   : > { %v877_v29 = vadd.f32 %v876_v59, %v875_v52 }
 0x1f3   : > { %878 = vadd.xlane.f32.xlu0 %v877_v29 }
 0x280   : > { %v879_v61 = vpop.xlane.xlu0 %878 }
 0x281   : > { %v880_v36 = vrot.slane %v879_v61, 4 }
 0x283   : > { %v881_v24 = vadd.f32 %v880_v36, %v879_v61 }
 0x285   : > { %v882_v27 = vrot.slane %v881_v24, 2 }
 0x287   : > { %v883_v0 = vadd.f32 %v882_v27, %v881_v24 }
 0x289   : > { %v884_v43 = vrot.slane %v883_v0, 1 }
 0x28b   : > { %v885_v44 = vadd.f32 %v884_v43, %v883_v0 }
 0x28d   : > { %1006 = vpush %v885_v44 }
 0x2be   : > { %s1007_s12 = spop %1006 }
 0x2bf   : > { %v887_v62 = vstv %s1007_s12 }
 0x2c0   : > { %v888_v16 = vadd.f32 %v887_v62, %v845_v31 }
 0x2c2   : > { %890 = vst.msk [vmem:[#allocation2] sm:$0x1] %vm242_vm0, %v888_v16 }
 0x2c3 PF:  {}
 0x2c9   : > { %v894_v15 = vld [vmem:[#allocation2] sm:$0x1] }
 0x2ca   : > { %896 = vst.msk [vmem:[%s237_s15] sm:$0x1] %vm242_vm0, %v894_v15 }
 0x2cb PF: > { %s18_s14 = sadd.s32 1, %s1313_s14   ;;  %s2342_s9 = smov %s1297_s10 }
 0x2cc   : > { %p15_p6 = scmp.ge.s32.totalorder %s18_s14, 4   ;;  %s2343_s10 = smov %s1301_s11 }
 0x2cd   : > { %s2344_s11 = smov %s1389_s24  ;;  %s2345_s12 = smov %s1309_s13 }
 0x2ce   : > { %s2346_s13 = smov %s2348_s16  ;;  %17 = sbr.rel (!%p15_p6) target bundleno = 6 (0x6), region = 93 }
 0x2d5   :  { %914 = vsyncpa [#allocation4], 1 }
 0x2d6   :  { %916 = vsyncpa [#allocation4 + $0x1], 1 }
 0x2d7   :  { %917 = vsyncpa [#allocation6], 1 }
 0x2d8   :  { %919 = vsyncpa [#allocation6 + $0x1], 1 }

</bundles_post_ra>
